<compile_context>
chip_gen: v6e
topology: v6e:2x2x1
jax: 0.10.0
libtpu: 0.0.40
codegen_flags: <defaults>
</compile_context>

<pallas_src>
import jax
import jax.numpy as jnp
from jax.experimental import pallas as pl
from jax.experimental.pallas import tpu as pltpu


# ---------------------------------------------------------------------------
# Generation-aware helpers
# ---------------------------------------------------------------------------
def _device_kind():
    try:
        return jax.local_devices()[0].device_kind.lower()
    except Exception:
        return ""


def _vmem_cap_bytes():
    try:
        cap = int(pltpu.get_tpu_info().vmem_capacity_bytes)
        if cap > 0:
            return cap
    except Exception:
        pass
    # v7x has 64 MiB/TC, v5e/v6e have 128 MiB.
    return (64 if "v7" in _device_kind() else 128) * 1024 * 1024


def _clamp_vmem(nbytes):
    # ~15% headroom below physical VMEM (≈54 MiB on v7x, ≈109 MiB on v5e/v6e).
    cap = int(_vmem_cap_bytes() * 0.85)
    return int(min(max(2 * nbytes, 16 * 1024 * 1024), cap))


def _round_up(n, m):
    return ((n + m - 1) // m) * m


def _largest_divisor_at_most(n, cap):
    for d in range(min(cap, n), 0, -1):
        if n % d == 0:
            return d
    return n


def _pad_gates_last(a, h, hp):
    """Pad the last (4*h) gate-packed dim to (4*hp), per gate segment."""
    if hp == h:
        return a
    lead = a.shape[:-1]
    a4 = a.reshape(lead + (4, h))
    a4 = jnp.pad(a4, [(0, 0)] * len(lead) + [(0, 0), (0, hp - h)])
    return a4.reshape(lead + (4 * hp,))


# ---------------------------------------------------------------------------
# Tiled dense (matmul + bias) kernel, used for Phase 0 (gates_x) and Phase 2
# (vocab projection).  Pads M/N up to aligned tiles instead of falling back to
# a single full-dimension block.
# ---------------------------------------------------------------------------
def dense_kernel(x_ref, w_ref, b_ref, o_ref):
    o_ref[...] = (jnp.dot(x_ref[...], w_ref[...],
                          preferred_element_type=jnp.float32)
                  + b_ref[...]).astype(o_ref.dtype)


def _tiled_dense(x, w, b, out_dtype, tm_pref=1024, tn_pref=1024):
    """(M,K) @ (K,N) + b(1,N) -> (M,N) in out_dtype, f32 accumulation."""
    M, K = x.shape
    N = w.shape[1]
    ed = jnp.dtype(x.dtype).itemsize
    od = jnp.dtype(out_dtype).itemsize

    tm = min(tm_pref, _round_up(M, 16))    # sublane-pack friendly for bf16
    tn = min(tn_pref, _round_up(N, 128))   # lane-dense output tiles

    budget = int(_vmem_cap_bytes() * 0.7)

    def _est(tm_, tn_):
        return 2 * (tm_ * K * ed + K * tn_ * ed + tn_ * 4 + tm_ * tn_ * od)

    while _est(tm, tn) > budget:
        if tm > 16 and tm >= tn:
            tm = max(16, ((tm // 2) // 16) * 16)
        elif tn > 128:
            tn = max(128, ((tn // 2) // 128) * 128)
        else:
            break

    Mp = _round_up(M, tm)
    Np = _round_up(N, tn)
    xp = x if Mp == M else jnp.pad(x, ((0, Mp - M), (0, 0)))
    wp = w if Np == N else jnp.pad(w, ((0, 0), (0, Np - N)))
    bp = (b if Np == N else jnp.pad(b, ((0, 0), (0, Np - N)))).astype(jnp.float32)

    out = pl.pallas_call(
        dense_kernel,
        out_shape=jax.ShapeDtypeStruct((Mp, Np), out_dtype),
        grid_spec=pltpu.PrefetchScalarGridSpec(
            num_scalar_prefetch=0,
            grid=(Mp // tm, Np // tn),
            in_specs=[
                pl.BlockSpec((tm, K), lambda i, j: (i, 0)),
                pl.BlockSpec((K, tn), lambda i, j: (0, j)),
                pl.BlockSpec((1, tn), lambda i, j: (0, j)),
            ],
            out_specs=pl.BlockSpec((tm, tn), lambda i, j: (i, j)),
        ),
        compiler_params=pltpu.CompilerParams(
            dimension_semantics=("parallel", "parallel"),
            vmem_limit_bytes=_clamp_vmem(_est(tm, tn))),
    )(xp, wp, bp)
    if Mp != M or Np != N:
        out = out[:M, :N]
    return out


# ---------------------------------------------------------------------------
# Phase 1: LSTM recurrence (time-chunked, h/c carried in VMEM scratch).
# gates_x (= x@W_ih + b) is precomputed, so each step only does h @ W_hh.
# ---------------------------------------------------------------------------
def lstm_recurrence_kernel(gx_ref, whh_ref, h0_ref, c0_ref,
                           h_all_ref, h_out_ref, c_out_ref, h_scr, c_scr):
    t = pl.program_id(1)

    @pl.when(t == 0)
    def _():
        h_scr[...] = h0_ref[...]
        c_scr[...] = c0_ref[...]

    w_hh = whh_ref[...]                 # (Hp, 4Hp), compute dtype, resident
    cdt = w_hh.dtype
    Hp = w_hh.shape[0]
    t_chunk = gx_ref.shape[0]

    def sig(x):                         # sigmoid via tanh: one EUP op per gate
        return 0.5 * (jnp.tanh(0.5 * x) + 1.0)

    def step(i, carry):
        h, c = carry                    # f32 carries
        gates = gx_ref[i] + jnp.dot(h.astype(cdt), w_hh,
                                    preferred_element_type=jnp.float32)
        i_g = sig(gates[:, 0 * Hp:1 * Hp])
        f_g = sig(gates[:, 1 * Hp:2 * Hp])
        g_g = jnp.tanh(gates[:, 2 * Hp:3 * Hp])
        o_g = sig(gates[:, 3 * Hp:4 * Hp])
        c_new = f_g * c + i_g * g_g
        h_new = o_g * jnp.tanh(c_new)
        h_all_ref[i] = h_new.astype(h_all_ref.dtype)
        return h_new, c_new

    h_fin, c_fin = jax.lax.fori_loop(0, t_chunk, step,
                                     (h_scr[...], c_scr[...]), unroll=True)

    h_scr[...] = h_fin
    c_scr[...] = c_fin
    # Written every chunk (same output block); the last grid step along the
    # "arbitrary" time axis leaves the final state.
    h_out_ref[...] = h_fin
    c_out_ref[...] = c_fin


def _run_phase1(gates_x, w_hh_c, h0_p, c0_p, *, time_chunk, batch_block,
                out_dtype, single_buffer):
    S, B, H4 = gates_x.shape
    Hp = w_hh_c.shape[0]
    ed = jnp.dtype(w_hh_c.dtype).itemsize
    od = jnp.dtype(out_dtype).itemsize

    def _resident(shape, index_map):
        # Constant-index blocks: single-buffer to halve weight VMEM.
        if single_buffer:
            return pl.BlockSpec(shape, index_map, pipeline_mode=pl.Buffered(1))
        return pl.BlockSpec(shape, index_map)

    wbuf = 1 if single_buffer else 2
    est = (2 * time_chunk * batch_block * H4 * 4        # gates_x chunk (f32)
           + wbuf * Hp * H4 * ed                        # W_hh
           + 2 * wbuf * batch_block * Hp * 4            # h0, c0
           + 2 * time_chunk * batch_block * Hp * od     # h_all chunk
           + 4 * batch_block * Hp * 4                   # h_out, c_out
           + 2 * batch_block * Hp * 4)                  # scratch

    return pl.pallas_call(
        lstm_recurrence_kernel,
        out_shape=(jax.ShapeDtypeStruct((S, B, Hp), out_dtype),
                   jax.ShapeDtypeStruct((B, Hp), jnp.float32),
                   jax.ShapeDtypeStruct((B, Hp), jnp.float32)),
        grid_spec=pltpu.PrefetchScalarGridSpec(
            num_scalar_prefetch=0,
            grid=(B // batch_block, S // time_chunk),
            in_specs=[
                pl.BlockSpec((time_chunk, batch_block, H4),
                             lambda bb, tt: (tt, bb, 0)),          # gates_x chunk
                _resident((Hp, H4), lambda bb, tt: (0, 0)),        # W_hh (resident)
                _resident((batch_block, Hp), lambda bb, tt: (bb, 0)),  # h0
                _resident((batch_block, Hp), lambda bb, tt: (bb, 0)),  # c0
            ],
            out_specs=(
                pl.BlockSpec((time_chunk, batch_block, Hp),
                             lambda bb, tt: (tt, bb, 0)),          # hidden states
                pl.BlockSpec((batch_block, Hp), lambda bb, tt: (bb, 0)),  # final h
                pl.BlockSpec((batch_block, Hp), lambda bb, tt: (bb, 0)),  # final c
            ),
            scratch_shapes=[pltpu.VMEM((batch_block, Hp), jnp.float32),   # h carry
                            pltpu.VMEM((batch_block, Hp), jnp.float32)],  # c carry
        ),
        compiler_params=pltpu.CompilerParams(
            dimension_semantics=("parallel", "arbitrary"),
            vmem_limit_bytes=_clamp_vmem(est)),
    )(gates_x, w_hh_c, h0_p, c0_p)


# ---------------------------------------------------------------------------
# Full forward
# ---------------------------------------------------------------------------
def lstm_model_forward(tokens, params, prev_state,
                       compute_dtype=jnp.bfloat16, time_chunk=None,
                       batch_block=None, logits_dtype=None):
    """tokens: (S, B) int32; prev_state: (h0, c0) each (1, B, H) f32."""
    embedding = params["embedding"]      # (V, E)
    w_ih = params["w_ih"]                # (E, 4H)
    w_hh = params["w_hh"]                # (H, 4H)
    b = params["b"]                      # (1, 4H)  (= b_ih + b_hh)
    w_dense = params["w_dense"]          # (H, V)
    b_dense = params["b_dense"]          # (1, V)

    h0, c0 = prev_state
    S, B = tokens.shape
    E = embedding.shape[1]
    H = h0.shape[-1]
    V = w_dense.shape[1]
    if logits_dtype is None:
        logits_dtype = compute_dtype

    if time_chunk is None:
        time_chunk = _largest_divisor_at_most(S, 32)
    assert S % time_chunk == 0

    if batch_block is None:
        # Split batch across v7x's two TensorCores when sublane alignment allows.
        if "v7" in _device_kind() and B % 16 == 0:
            batch_block = B // 2
        else:
            batch_block = B
    assert B % batch_block == 0
    assert batch_block == B or batch_block % 8 == 0

    # Pad hidden dim to a multiple of 128: lane-dense per-step stores and
    # vreg-aligned gate slices.  Padded columns stay exactly zero through the
    # recurrence (zero-padded weights/bias -> g=0, c stays 0, h stays 0).
    Hp = _round_up(H, 128)
    w_ih_p = _pad_gates_last(w_ih, H, Hp)                              # (E, 4Hp)
    b_p = _pad_gates_last(b, H, Hp)                                    # (1, 4Hp)
    w_hh_p = _pad_gates_last(jnp.pad(w_hh, ((0, Hp - H), (0, 0))), H, Hp)  # (Hp,4Hp)
    w_dense_p = jnp.pad(w_dense, ((0, Hp - H), (0, 0)))                # (Hp, V)
    h0_p = jnp.pad(h0[0], ((0, 0), (0, Hp - H)))                       # (B, Hp)
    c0_p = jnp.pad(c0[0], ((0, 0), (0, Hp - H)))                       # (B, Hp)

    # Embedding gather (glue) + low-precision cast for the MXU inputs.
    # TODO(synk): fuse the gather into the gates_x kernel via scalar-prefetch
    # (pl.Element row gather) to avoid materializing (S,B,E) through HBM.
    embed = jnp.take(embedding, tokens, axis=0).astype(compute_dtype)  # (S,B,E)

    # ---------------- Phase 0: gates_x = embed @ W_ih + b  (parallel) --------
    gates_x2d = _tiled_dense(embed.reshape(S * B, E),
                             w_ih_p.astype(compute_dtype), b_p,
                             jnp.float32)                    # (S*B, 4Hp) f32
    gates_x = gates_x2d.reshape(S, B, 4 * Hp)

    # ---------------- Phase 1: serial recurrence -----------------------------
    w_hh_c = w_hh_p.astype(compute_dtype)
    try:
        h_all, h_out, c_out = _run_phase1(
            gates_x, w_hh_c, h0_p, c0_p, time_chunk=time_chunk,
            batch_block=batch_block, out_dtype=compute_dtype,
            single_buffer=True)
    except Exception:
        # Fallback if pipeline_mode=pl.Buffered(1) is unsupported in this JAX.
        h_all, h_out, c_out = _run_phase1(
            gates_x, w_hh_c, h0_p, c0_p, time_chunk=time_chunk,
            batch_block=batch_block, out_dtype=compute_dtype,
            single_buffer=False)

    # ---------------- Phase 2: vocab projection (parallel) -------------------
    logits2d = _tiled_dense(h_all.reshape(S * B, Hp),
                            w_dense_p.astype(compute_dtype), b_dense,
                            logits_dtype, tm_pref=1024, tn_pref=1024)
    logits = logits2d.reshape(S, B, V)

    state = (h_out[:, :H][None], c_out[:, :H][None])
    return logits, state


# ---------------------------------------------------------------------------
# Params / reference / test
# ---------------------------------------------------------------------------
def init_params(key, n_vocab, embedding_size, lstm_size):
    ks = jax.random.split(key, 6)
    scale = 0.1
    return {
        "embedding": scale * jax.random.normal(
            ks[0], (n_vocab, embedding_size), jnp.float32),
        "w_ih": scale * jax.random.normal(
            ks[1], (embedding_size, 4 * lstm_size), jnp.float32),
        "w_hh": scale * jax.random.normal(
            ks[2], (lstm_size, 4 * lstm_size), jnp.float32),
        "b": scale * jax.random.normal(
            ks[3], (1, 4 * lstm_size), jnp.float32),
        "w_dense": scale * jax.random.normal(
            ks[4], (lstm_size, n_vocab), jnp.float32),
        "b_dense": scale * jax.random.normal(
            ks[5], (1, n_vocab), jnp.float32),
    }


def _reference_forward(tokens, params, prev_state):
    """Pure-JAX f32 reference (same math as the PyTorch module's forward)."""
    embed = jnp.take(params["embedding"], tokens, axis=0)
    H = prev_state[0].shape[-1]

    def step(carry, x_t):
        h, c = carry
        gates = x_t @ params["w_ih"] + h @ params["w_hh"] + params["b"]
        i = jax.nn.sigmoid(gates[:, 0 * H:1 * H])
        f = jax.nn.sigmoid(gates[:, 1 * H:2 * H])
        g = jnp.tanh(gates[:, 2 * H:3 * H])
        o = jax.nn.sigmoid(gates[:, 3 * H:4 * H])
        c_new = f * c + i * g
        h_new = o * jnp.tanh(c_new)
        return (h_new, c_new), h_new @ params["w_dense"] + params["b_dense"]

    (h, c), logits = jax.lax.scan(step, (prev_state[0][0], prev_state[1][0]),
                                  embed)
    return logits, (h[None], c[None])


if __name__ == "__main__":
    n_vocab, embedding_size, lstm_size = 50, 16, 32
    seq, batch = 8, 2

    key = jax.random.PRNGKey(0)
    k_param, k_tok = jax.random.split(key)
    params = init_params(k_param, n_vocab, embedding_size, lstm_size)

    tokens = jax.random.randint(k_tok, (seq, batch), 0, n_vocab, dtype=jnp.int32)
    zero_state = (jnp.zeros((1, batch, lstm_size), jnp.float32),
                  jnp.zeros((1, batch, lstm_size), jnp.float32))

    ref_logits, (ref_h, ref_c) = _reference_forward(tokens, params, zero_state)

    # Accuracy check: f32 compute path (multi-chunk grid exercises the carry).
    logits32, (h32, c32) = lstm_model_forward(
        tokens, params, zero_state, compute_dtype=jnp.float32, time_chunk=4,
        logits_dtype=jnp.float32)
    jax.block_until_ready((logits32, h32, c32))
    assert logits32.shape == (seq, batch, n_vocab)
    assert h32.shape == (1, batch, lstm_size)
    assert c32.shape == (1, batch, lstm_size)
    assert jnp.allclose(logits32, ref_logits, atol=1e-4, rtol=1e-4)
    assert jnp.allclose(h32, ref_h, atol=1e-4, rtol=1e-4)
    assert jnp.allclose(c32, ref_c, atol=1e-4, rtol=1e-4)

    # Fast path (default): bf16 MXU inputs / bf16 logits, f32 accumulation.
    logits_bf, (h_bf, c_bf) = lstm_model_forward(
        tokens, params, zero_state, time_chunk=4)
    jax.block_until_ready((logits_bf, h_bf, c_bf))
    assert logits_bf.shape == (seq, batch, n_vocab)
    assert jnp.allclose(logits_bf.astype(jnp.float32), ref_logits, atol=3e-2)
    assert jnp.allclose(h_bf, ref_h, atol=3e-2)
    assert jnp.allclose(c_bf, ref_c, atol=3e-2)

    print("KERNEL_OK")
</pallas_src>

<mosaic_0001>
module attributes {stable_mosaic.version = 11 : i64} {
  func.func @dense_kernel(%arg0: i32, %arg1: i32, %arg2: memref<16x16xf32, #tpu.memory_space<vmem>>, %arg3: memref<16x512xf32, #tpu.memory_space<vmem>>, %arg4: memref<1x512xf32, #tpu.memory_space<vmem>>, %arg5: memref<16x512xf32, #tpu.memory_space<vmem>>) attributes {dimension_semantics = [#tpu.dimension_semantics<parallel>, #tpu.dimension_semantics<parallel>], iteration_bounds = array<i64: 1, 1>, scalar_prefetch = 0 : i64, scratch_operands = 0 : i64, tpu.core_type = #tpu.core_type<tc>, window_params = [{transform_indices = @transform_0, window_bounds = array<i64: 16, 16>}, {transform_indices = @transform_1, window_bounds = array<i64: 16, 512>}, {transform_indices = @transform_2, window_bounds = array<i64: 1, 512>}, {transform_indices = @transform_3, window_bounds = array<i64: 16, 512>}]} {
    %c0 = arith.constant 0 : index
    %c0_0 = arith.constant 0 : index
    %0 = vector.load %arg2[%c0, %c0_0] : memref<16x16xf32, #tpu.memory_space<vmem>>, vector<16x16xf32>
    %c0_1 = arith.constant 0 : index
    %c0_2 = arith.constant 0 : index
    %1 = vector.load %arg3[%c0_1, %c0_2] : memref<16x512xf32, #tpu.memory_space<vmem>>, vector<16x512xf32>
    %cst = arith.constant dense<0.000000e+00> : vector<16x512xf32>
    %2 = tpu.matmul %0, %1, %cst {dimension_numbers = #tpu.dot_dimension_numbers<[1], [0], [0], [1], [0, 0, 1, 1], [], []>} : vector<16x16xf32>, vector<16x512xf32>, vector<16x512xf32> -> vector<16x512xf32>
    %c0_3 = arith.constant 0 : index
    %c0_4 = arith.constant 0 : index
    %3 = vector.load %arg4[%c0_3, %c0_4] : memref<1x512xf32, #tpu.memory_space<vmem>>, vector<1x512xf32>
    %4 = vector.broadcast %3 : vector<1x512xf32> to vector<16x512xf32>
    %5 = arith.addf %2, %4 : vector<16x512xf32>
    %c0_5 = arith.constant 0 : index
    %c0_6 = arith.constant 0 : index
    %6 = vector.load %arg5[%c0_5, %c0_6] : memref<16x512xf32, #tpu.memory_space<vmem>>, vector<16x512xf32>
    tpu.vector_store %arg5[%c0_5, %c0_6], %5 {strides = array<i32>} : memref<16x512xf32, #tpu.memory_space<vmem>>, vector<16x512xf32>,
    return
  }
  func.func @transform_0(%arg0: i32, %arg1: i32) -> (i32, i32) {
    %c0_i32 = arith.constant 0 : i32
    %c0_i32_0 = arith.constant 0 : i32
    return %arg0, %c0_i32 : i32, i32
  }
  func.func @transform_1(%arg0: i32, %arg1: i32) -> (i32, i32) {
    %c0_i32 = arith.constant 0 : i32
    %c0_i32_0 = arith.constant 0 : i32
    return %c0_i32, %arg1 : i32, i32
  }
  func.func @transform_2(%arg0: i32, %arg1: i32) -> (i32, i32) {
    %c0_i32 = arith.constant 0 : i32
    %c0_i32_0 = arith.constant 0 : i32
    return %c0_i32, %arg1 : i32, i32
  }
  func.func @transform_3(%arg0: i32, %arg1: i32) -> (i32, i32) {
    %c0_i32 = arith.constant 0 : i32
    return %arg0, %arg1 : i32, i32
  }
}

</mosaic_0001>

<bundles_post_ra>
// kernel: tpu_custom_call.1
= control target key start
LH: loop header
LB: loop body
LE: loop exit
PB: predicated region body
PF: predicated region fallthrough
CT: control target
= control target key end

     0   :  { %8 = vsyncpa [#allocation3], 0  ;;  %s419_s0 = inlined_call_operand.hbm [shape: f32[16,16], index: 0, kind: input, shape index: {}]   ;;  %s420_s1 = inlined_call_operand.hbm [shape: f32[16,512], index: 1, kind: input, shape index: {}]   ;;  %s421_s2 = inlined_call_operand.hbm [shape: f32[1,512], index: 2, kind: input, shape index: {}]   ;;  %s422_s3 = inlined_call_operand.hbm [shape: f32[16,512], index: 3, kind: output, shape index: {}]  }
   0x1   :  { %9 = vsyncpa [#allocation6], 0 }
   0x2   :  { %10 = vsyncpa [#allocation4], 0  ;;  %s372_s12 = smov [#allocation5]  }
   0x3   :  { %s28_s13 = sshll.u32 %s372_s12, 4  ;;  %s29_s13 = int_to_ptr.vmem [resolvable:$true] %s28_s13 }
   0x4   :  { %s294_s14 = scalar_lea.vmem %s29_s13, 1024  ;;  %p299_p1 = scmp.lt.s32.totalorder %s29_s13, %s29_s13 }
   0x5   :  { %p295_p0 = scmp.ne.s32.totalorder %s29_s13, %s294_s14  ;;  %p300_p2 = scmp.lt.s32.totalorder %s294_s14, %s294_s14 }
   0x7   :  { %p301_p3 = por %p300_p2, %p299_p1 }
   0x9   :  { %p302_p4 = pnand %p301_p3, %p295_p0 }
   0xb   :  { %305 = shalt.err (!%p302_p4)
}
   0xc   :  { %s373_s15 = smov 512   ;;  %s374_s16 = smov 32  }
   0xd   :  { %34 = dma.hbm_to_vmem [thread:$0]  %s420_s1, 1024, %s29_s13, [#allocation6], %s373_s15, %s373_s15, %s374_s16  }
   0xe   :  { %s375_s19 = smov [#allocation2]  }
   0xf   :  { %s16_s20 = sshll.u32 %s375_s19, 4  ;;  %s17_s20 = int_to_ptr.vmem [resolvable:$true] %s16_s20 }
  0x10   :  { %s314_s21 = scalar_lea.vmem %s17_s20, 256  ;;  %p319_p6 = scmp.lt.s32.totalorder %s17_s20, %s17_s20 }
  0x11   :  { %p315_p5 = scmp.ne.s32.totalorder %s17_s20, %s314_s21  ;;  %p320_p7 = scmp.lt.s32.totalorder %s314_s21, %s314_s21 }
  0x13   :  { %p321_p8 = por %p320_p7, %p319_p6 }
  0x15   :  { %p322_p9 = pnand %p321_p8, %p315_p5 }
  0x17   :  { %325 = shalt.err (!%p322_p9)
}
  0x18   :  { %s376_s22 = smov 128   ;;  %s377_s23 = smov 8  }
  0x19   :  { %22 = dma.hbm_to_vmem [thread:$0]  %s419_s0, 256, %s17_s20, [#allocation3], %s376_s22, %s376_s22, %s377_s23  }
  0x1a   :  { %s378_s26 = smov [#allocation7]  }
  0x1b   :  { %s41_s27 = sshll.u32 %s378_s26, 4  ;;  %s42_s27 = int_to_ptr.vmem [resolvable:$true] %s41_s27 }
  0x1c   :  { %s334_s1 = scalar_lea.vmem %s42_s27, 64  ;;  %p339_p11 = scmp.lt.s32.totalorder %s42_s27, %s42_s27 }
  0x1d   :  { %p335_p10 = scmp.ne.s32.totalorder %s42_s27, %s334_s1  ;;  %p340_p12 = scmp.lt.s32.totalorder %s334_s1, %s334_s1 }
  0x1f   :  { %p341_p13 = por %p340_p12, %p339_p11 }
  0x21   :  { %p342_p0 = pnand %p341_p13, %p335_p10 }
  0x23   :  { %345 = shalt.err (!%p342_p0)
}
  0x24   :  { %44 = dma.hbm_to_vmem [thread:$0]  %s421_s2, 64, %s42_s27, [#allocation6]  }
  0x25   :  { %366 = dma.done.wait [#allocation3], 256  }
  0x26   :  { %367 = vsyncadd [#allocation3], 4294967040 }
  0x27   :  { %368 = dma.done.wait [#allocation6], 1088  }
  0x28   :  { %369 = vsyncadd [#allocation6], 4294966208  ;;  %v379_v0 = vmov 0.0   ;;  %v61_v1 = vld [vmem:[#allocation5 + $0x28] sm:$0xff]  ;;  %v63_v2 = vld [vmem:[#allocation5 + $0x38] sm:$0xff]  ;;  %vm86_vm0 = vcmask 130048   ;;  %v66_v11 = vlaneseq }
  0x29   :  { %157 = vmatprep.mubr.f32.mxu0 %v379_v0  ;;  %234 = vmatprep.mubr.f32.mxu1 %v379_v0  ;;  %v60_v3 = vld [vmem:[#allocation5 + $0x20] sm:$0xff]  ;;  %v62_v4 = vld [vmem:[#allocation5 + $0x30] sm:$0xff]  ;;  %v57_v5 = vld [vmem:[#allocation5 + $0x8] sm:$0xff]  ;;  %s380_s0 = smov [#allocation8]  }
  0x2a   :  { %121 = vmatprep.subr.mxu0 %v61_v1  ;;  %198 = vmatprep.subr.mxu1 %v63_v2  ;;  %v59_v6 = vld [vmem:[#allocation5 + $0x18] sm:$0xff]  ;;  %v56_v7 = vld [vmem:[#allocation5] sm:$0xff]  ;;  %v58_v8 = vld [vmem:[#allocation5 + $0x10] sm:$0xff]  ;;  %v67_v12 = vshrl.u32 %v66_v11, 7  ;;  %s260_s2 = sshll.u32 %s380_s0, 4  ;;  %s261_s2 = int_to_ptr.vmem [resolvable:$true] %s260_s2 }
  0x2b   :  { %122 = vmatpush1.msra.mxu0 %v60_v3  ;;  %199 = vmatpush1.msra.mxu1 %v62_v4  ;;  %v54_v9 = vld [vmem:[#allocation2] sm:$0xff]  ;;  %v55_v10 = vld [vmem:[#allocation2 + $0x8] sm:$0xff]  ;;  %v64_v15 = vld [vmem:[#allocation7] sm:$0xf]  ;;  %s346_s30 = scalar_lea.vmem %s261_s2, 1024  ;;  %p351_p2 = scmp.lt.s32.totalorder %s261_s2, %s261_s2 }
  0x2c   :  { %123 = vmatprep.subr.mxu0 %v57_v5  ;;  %200 = vmatprep.subr.mxu1 %v59_v6  ;;  %v68_v13 = vsub.s32 0, %v67_v12  ;;  %v76_v14 = vsub.s32 2, %v67_v12  ;;  %v72_v16 = vsub.s32 1, %v67_v12  ;;  %v80_v17 = vsub.s32 3, %v67_v12  ;;  %p347_p1 = scmp.ne.s32.totalorder %s261_s2, %s346_s30  ;;  %p352_p3 = scmp.lt.s32.totalorder %s346_s30, %s346_s30 }
  0x2d   :  { %124 = vmatpush1.msra.mxu0 %v56_v7  ;;  %201 = vmatpush1.msra.mxu1 %v58_v8 }
  0x2e   :  { %273 = vmatmul.mubr.msk.f32.vlgmr.msra.gmra.mxu0 %vm86_vm0, %v54_v9  ;;  %275 = vmatmul.mubr.msk.f32.vlgmr.msra.gmra.mxu1 %vm86_vm0, %v54_v9  ;;  %v69_v18 = vrot.slane %v64_v15, %v68_v13  ;;  %v77_v19 = vrot.slane %v64_v15, %v76_v14  ;;  %v73_v20 = vrot.slane %v64_v15, %v72_v16  ;;  %p353_p4 = por %p352_p3, %p351_p2 }
  0x2f   :  { %163 = vmatprep.mubr.f32.mxu0 %v379_v0  ;;  %240 = vmatprep.mubr.f32.mxu1 %v379_v0  ;;  %v81_v21 = vrot.slane %v64_v15, %v80_v17 }
  0x30   :  { %p354_p5 = pnand %p353_p4, %p347_p1 }
  0x32   :  { %274 = vmatmul.mubr.msk.f32.gmra.mxu0 %vm86_vm0, %v55_v10  ;;  %276 = vmatmul.mubr.msk.f32.gmra.mxu1 %vm86_vm0, %v55_v10 }
  0xee   :  { %v159_v22 = vpop.f32.mrf.mxu0  ;;  %v236_v23 = vpop.f32.mrf.mxu1 }
  0xef   :  { %v160_v24 = vadd.f32 %v159_v22, %v69_v18  ;;  %v237_v25 = vadd.f32 %v236_v23, %v77_v19 }
  0xf0   :  { %v161_v26 = vpop.f32.mrf.mxu0  ;;  %v238_v27 = vpop.f32.mrf.mxu1 }
  0xf1   :  { %247 = vst [vmem:[#allocation8] sm:$0xff] %v160_v24  ;;  %249 = vst [vmem:[#allocation8 + $0x10] sm:$0xff] %v237_v25  ;;  %v162_v28 = vadd.f32 %v161_v26, %v73_v20  ;;  %v239_v29 = vadd.f32 %v238_v27, %v81_v21 }
  0xf2   :  { %v165_v30 = vpop.f32.mrf.mxu0  ;;  %v242_v31 = vpop.f32.mrf.mxu1 }
  0xf3   :  { %248 = vst [vmem:[#allocation8 + $0x8] sm:$0xff] %v162_v28  ;;  %250 = vst [vmem:[#allocation8 + $0x18] sm:$0xff] %v239_v29  ;;  %v166_v32 = vadd.f32 %v165_v30, %v69_v18  ;;  %v243_v33 = vadd.f32 %v242_v31, %v77_v19 }
  0xf4   :  { %v167_v34 = vpop.f32.mrf.mxu0  ;;  %v244_v35 = vpop.f32.mrf.mxu1 }
  0xf5   :  { %251 = vst [vmem:[#allocation8 + $0x20] sm:$0xff] %v166_v32  ;;  %253 = vst [vmem:[#allocation8 + $0x30] sm:$0xff] %v243_v33  ;;  %v168_v36 = vadd.f32 %v167_v34, %v73_v20  ;;  %v245_v37 = vadd.f32 %v244_v35, %v81_v21 }
  0xf7   :  { %252 = vst [vmem:[#allocation8 + $0x28] sm:$0xff] %v168_v36  ;;  %254 = vst [vmem:[#allocation8 + $0x38] sm:$0xff] %v245_v37 }
  0xf8   :  { %357 = shalt.err (!%p354_p5)
}
  0xf9   :  { %266 = dma.vmem_to_hbm [thread:$0]  %s261_s2, 1024, %s422_s3, [#allocation4], %s373_s15, %s373_s15, %s374_s16  }
  0xfa   :  { %370 = dma.done.wait [#allocation4], 1024  }
  0xfb   :  { %371 = vsyncadd [#allocation4], 4294966272 }
  0xfc   :  { %270 = vsyncpa [#allocation3], 1 }
  0xfd   :  { %271 = vsyncpa [#allocation6], 1 }
  0xfe   :  { %272 = vsyncpa [#allocation4], 1 }

</bundles_post_ra>
